<compile_context>
chip_gen: v7x
topology: tpu7x:2x2x1
jax: 0.10.0
libtpu: 0.0.40
codegen_flags: <defaults>
</compile_context>

<pallas_src>
import functools

import jax
import jax.numpy as jnp
from jax.experimental import pallas as pl
from jax.experimental.pallas import tpu as pltpu

NUM_TASKS = 2   # "binary_classification", "regression"
TASK_OUT = 8    # stored output width: tasks zero-padded to 8 lanes (cols 2..7 unused)


def head_kernel(x_ref, wb_ref, bb_ref, wt_ref, bt_ref, out_ref):
    # body: h = relu(x @ W_body + b_body); bf16 inputs, f32 accumulation.
    h = jnp.dot(x_ref[...], wb_ref[...], preferred_element_type=jnp.float32)
    h = jnp.maximum(h + bb_ref[...], 0.0)                          # (TB, H) f32

    # both task heads fused into one narrow matmul:
    #   col 0 -> binary_classification logits, col 1 -> regression,
    #   cols 2..7 -> zero padding (sliced off in the wrapper).
    logits = jnp.dot(h, wt_ref[...], preferred_element_type=jnp.float32) + bt_ref[...]
    col = jax.lax.broadcasted_iota(jnp.int32, logits.shape, 1)
    # sigmoid only on the classification column; regression stays linear.
    out_ref[...] = jnp.where(col == 0, jax.nn.sigmoid(logits), logits)


def _round_up(x, m):
    return ((x + m - 1) // m) * m


def _pick_block_b(B):
    # Large tiles amortize the ~0.35us per-grid-step overhead.  For moderate
    # and large batches use >=2 tiles so the "parallel" grid axis can shard
    # across v7x's two TensorCores.  Multiples of 16 keep bf16 sublane packing
    # unmasked; multiples of 256 keep big-batch MXU tiles clean.  Cap at 2048:
    # per-tile VMEM (double-buffered x + replicated weights) stays trivially
    # under v5e's 16 MiB scoped default at these shapes.
    if B <= 512:
        return _round_up(B, 16)
    if B <= 1024:
        return _round_up(pl.cdiv(B, 2), 16)
    return min(2048, _round_up(pl.cdiv(B, 2), 256))


@functools.partial(jax.jit, static_argnames=("block_b",))
def head_forward(x, w_body, b_body, w_cls, b_cls, w_reg, b_reg, *, block_b=None):
    B, D_in = x.shape
    H = w_body.shape[1]
    if block_b is None:
        block_b = _pick_block_b(B)

    # bf16 inputs / f32 accumulation halve the dominant x-read HBM traffic
    # (v5e/v6e gain the most).  In production the caller should hand us bf16
    # directly so this cast fuses upstream instead of being a separate pass.
    x = x.astype(jnp.bfloat16)
    w_body = w_body.astype(jnp.bfloat16)

    # Fuse both 1-wide task heads into one narrow (H, 8) weight / (1, 8) bias
    # row via concatenate + zero pad (no scatter ops in the per-call path).
    pad = TASK_OUT - NUM_TASKS
    w_tasks = jnp.concatenate(
        [w_cls, w_reg, jnp.zeros((H, pad), jnp.float32)], axis=1)
    b_tasks = jnp.concatenate(
        [b_cls, b_reg, jnp.zeros((1, pad), jnp.float32)], axis=1)

    # Ragged batches: no wrapper-side jnp.pad (that would re-read/re-write all
    # of x in HBM); Pallas masks the partial last tile itself.  Garbage rows in
    # that tile only feed elementwise ops and their outputs are never stored.
    grid = (pl.cdiv(B, block_b),)

    def rep(i):                 # replicated (same block for every grid step)
        return (0, 0)

    def batched(i):             # tiled over batch
        return (i, 0)

    # TODO(synk): for production-sized D_in/H, add a K-tiling "arbitrary" grid
    # axis with an f32 VMEM accumulator (and set vmem_limit_bytes) instead of
    # replicating the full (D_in, H) W_body per tile.
    fused = pl.pallas_call(
        head_kernel,
        out_shape=jax.ShapeDtypeStruct((B, TASK_OUT), jnp.float32),
        grid_spec=pltpu.PrefetchScalarGridSpec(
            num_scalar_prefetch=0,
            grid=grid,
            in_specs=[
                pl.BlockSpec((block_b, D_in), batched),   # x (bf16)
                pl.BlockSpec((D_in, H), rep),             # W_body (bf16)
                pl.BlockSpec((1, H), rep),                # b_body (f32)
                pl.BlockSpec((H, TASK_OUT), rep),         # fused task weights
                pl.BlockSpec((1, TASK_OUT), rep),         # fused task biases
            ],
            out_specs=pl.BlockSpec((block_b, TASK_OUT), batched),
        ),
        compiler_params=pltpu.CompilerParams(
            dimension_semantics=("parallel",)),
    )(x, w_body, b_body, w_tasks, b_tasks)

    # Head.forward with multiple prediction tasks returns a dict keyed by task name.
    return {
        "binary_classification": fused[:, 0:1],
        "regression": fused[:, 1:2],
    }


def reference_forward(x, w_body, b_body, w_cls, b_cls, w_reg, b_reg):
    # Mirrors the kernel's bf16-input / f32-accumulation body matmul.
    h = jnp.dot(x.astype(jnp.bfloat16), w_body.astype(jnp.bfloat16),
                preferred_element_type=jnp.float32)
    h = jnp.maximum(h + b_body, 0.0)
    return {
        "binary_classification": jax.nn.sigmoid(
            jnp.dot(h, w_cls, preferred_element_type=jnp.float32) + b_cls),
        "regression": jnp.dot(h, w_reg, preferred_element_type=jnp.float32) + b_reg,
    }


if __name__ == "__main__":
    # Small, deterministic shapes consistent with the module's forward.
    D_in, H = 32, 128
    key = jax.random.PRNGKey(0)
    kwb, kbb, kwc, kbc, kwr, kbr, kx1, kx2, kx3 = jax.random.split(key, 9)

    # Deterministic synthetic parameters (PyTorch Linear weights are (out,in);
    # here we directly build the transposed (in,out) layout used by the kernel).
    w_body = jax.random.normal(kwb, (D_in, H), dtype=jnp.float32) * 0.1
    b_body = jax.random.normal(kbb, (1, H), dtype=jnp.float32) * 0.1
    w_cls = jax.random.normal(kwc, (H, 1), dtype=jnp.float32) * 0.1
    b_cls = jax.random.normal(kbc, (1, 1), dtype=jnp.float32) * 0.1
    w_reg = jax.random.normal(kwr, (H, 1), dtype=jnp.float32) * 0.1
    b_reg = jax.random.normal(kbr, (1, 1), dtype=jnp.float32) * 0.1

    cases = [
        (16, None, kx1),   # aligned, single tile
        (37, None, kx2),   # ragged -> single partial tile (masked stores)
        (70, 32, kx3),     # forced block_b -> multi-tile + ragged last tile
    ]
    for B, block_b, kx in cases:
        x = jax.random.normal(kx, (B, D_in), dtype=jnp.float32)

        out = head_forward(x, w_body, b_body, w_cls, b_cls, w_reg, b_reg,
                           block_b=block_b)
        out = jax.tree_util.tree_map(jax.block_until_ready, out)

        ref = reference_forward(x, w_body, b_body, w_cls, b_cls, w_reg, b_reg)
        for name in out:
            assert out[name].shape == (B, 1), (name, out[name].shape)
            assert jnp.allclose(out[name], ref[name], atol=2e-3, rtol=2e-3), name

    # TODO(synk): loss / metrics plumbing (compute_loss, calculate_metrics,
    # fit/evaluate) is training-time bookkeeping, not part of the forward hot
    # path, so it is not reproduced as a kernel.
    print("KERNEL_OK")
</pallas_src>

<mosaic_0001>
module attributes {stable_mosaic.version = 11 : i64} {
  func.func @head_kernel(%arg0: i32, %arg1: memref<16x32xbf16, #tpu.memory_space<vmem>>, %arg2: memref<32x128xbf16, #tpu.memory_space<vmem>>, %arg3: memref<1x128xf32, #tpu.memory_space<vmem>>, %arg4: memref<128x8xf32, #tpu.memory_space<vmem>>, %arg5: memref<1x8xf32, #tpu.memory_space<vmem>>, %arg6: memref<16x8xf32, #tpu.memory_space<vmem>>) attributes {dimension_semantics = [#tpu.dimension_semantics<parallel>], iteration_bounds = array<i64: 1>, scalar_prefetch = 0 : i64, scratch_operands = 0 : i64, tpu.core_type = #tpu.core_type<tc>, window_params = [{transform_indices = @transform_0, window_bounds = array<i64: 16, 32>}, {pipeline_mode = #tpu.pipeline_mode<synchronous>, transform_indices = @transform_1, window_bounds = array<i64: 32, 128>}, {pipeline_mode = #tpu.pipeline_mode<synchronous>, transform_indices = @transform_2, window_bounds = array<i64: 1, 128>}, {pipeline_mode = #tpu.pipeline_mode<synchronous>, transform_indices = @transform_3, window_bounds = array<i64: 128, 8>}, {pipeline_mode = #tpu.pipeline_mode<synchronous>, transform_indices = @transform_4, window_bounds = array<i64: 1, 8>}, {transform_indices = @transform_5, window_bounds = array<i64: 16, 8>}]} {
    %c0 = arith.constant 0 : index
    %c0_0 = arith.constant 0 : index
    %0 = vector.load %arg1[%c0, %c0_0] : memref<16x32xbf16, #tpu.memory_space<vmem>>, vector<16x32xbf16>
    %c0_1 = arith.constant 0 : index
    %c0_2 = arith.constant 0 : index
    %1 = vector.load %arg2[%c0_1, %c0_2] : memref<32x128xbf16, #tpu.memory_space<vmem>>, vector<32x128xbf16>
    %cst = arith.constant dense<0.000000e+00> : vector<16x128xf32>
    %2 = tpu.matmul %0, %1, %cst {dimension_numbers = #tpu.dot_dimension_numbers<[1], [0], [0], [1], [0, 0, 1, 1], [], []>} : vector<16x32xbf16>, vector<32x128xbf16>, vector<16x128xf32> -> vector<16x128xf32>
    %c0_3 = arith.constant 0 : index
    %c0_4 = arith.constant 0 : index
    %3 = vector.load %arg3[%c0_3, %c0_4] : memref<1x128xf32, #tpu.memory_space<vmem>>, vector<1x128xf32>
    %4 = vector.broadcast %3 : vector<1x128xf32> to vector<16x128xf32>
    %5 = arith.addf %2, %4 : vector<16x128xf32>
    %cst_5 = arith.constant 0.000000e+00 : f32
    %6 = vector.broadcast %cst_5 : f32 to vector<16x128xf32>
    %7 = arith.maximumf %5, %6 : vector<16x128xf32>
    %c0_6 = arith.constant 0 : index
    %c0_7 = arith.constant 0 : index
    %8 = vector.load %arg4[%c0_6, %c0_7] : memref<128x8xf32, #tpu.memory_space<vmem>>, vector<128x8xf32>
    %cst_8 = arith.constant dense<0.000000e+00> : vector<16x8xf32>
    %9 = tpu.matmul %7, %8, %cst_8 {dimension_numbers = #tpu.dot_dimension_numbers<[1], [0], [0], [1], [0, 0, 1, 1], [], []>} : vector<16x128xf32>, vector<128x8xf32>, vector<16x8xf32> -> vector<16x8xf32>
    %c0_9 = arith.constant 0 : index
    %c0_10 = arith.constant 0 : index
    %10 = vector.load %arg5[%c0_9, %c0_10] : memref<1x8xf32, #tpu.memory_space<vmem>>, vector<1x8xf32>
    %11 = vector.broadcast %10 : vector<1x8xf32> to vector<16x8xf32>
    %12 = arith.addf %9, %11 : vector<16x8xf32>
    %13 = tpu.iota {dimensions = array<i32: 1>} : vector<16x8xi32>
    %c0_i32 = arith.constant 0 : i32
    %14 = vector.broadcast %c0_i32 : i32 to vector<16x8xi32>
    %15 = arith.cmpi eq, %13, %14 : vector<16x8xi32>
    %16 = arith.negf %12 : vector<16x8xf32>
    %17 = math.exp %16 : vector<16x8xf32>
    %cst_11 = arith.constant 1.000000e+00 : f32
    %18 = vector.broadcast %cst_11 : f32 to vector<16x8xf32>
    %19 = arith.addf %18, %17 : vector<16x8xf32>
    %20 = arith.divf %18, %19 : vector<16x8xf32>
    %21 = arith.select %15, %20, %12 : vector<16x8xi1>, vector<16x8xf32>
    %c0_12 = arith.constant 0 : index
    %c0_13 = arith.constant 0 : index
    %22 = vector.load %arg6[%c0_12, %c0_13] : memref<16x8xf32, #tpu.memory_space<vmem>>, vector<16x8xf32>
    tpu.vector_store %arg6[%c0_12, %c0_13], %21 {strides = array<i32>} : memref<16x8xf32, #tpu.memory_space<vmem>>, vector<16x8xf32>,
    return
  }
  func.func @transform_0(%arg0: i32) -> (i32, i32) {
    %c0_i32 = arith.constant 0 : i32
    %c0_i32_0 = arith.constant 0 : i32
    return %arg0, %c0_i32 : i32, i32
  }
  func.func @transform_1(%arg0: i32) -> (i32, i32) {
    %c0_i32 = arith.constant 0 : i32
    %c0_i32_0 = arith.constant 0 : i32
    %c0_i32_1 = arith.constant 0 : i32
    return %c0_i32, %c0_i32_0 : i32, i32
  }
  func.func @transform_2(%arg0: i32) -> (i32, i32) {
    %c0_i32 = arith.constant 0 : i32
    %c0_i32_0 = arith.constant 0 : i32
    %c0_i32_1 = arith.constant 0 : i32
    return %c0_i32, %c0_i32_0 : i32, i32
  }
  func.func @transform_3(%arg0: i32) -> (i32, i32) {
    %c0_i32 = arith.constant 0 : i32
    %c0_i32_0 = arith.constant 0 : i32
    %c0_i32_1 = arith.constant 0 : i32
    return %c0_i32, %c0_i32_0 : i32, i32
  }
  func.func @transform_4(%arg0: i32) -> (i32, i32) {
    %c0_i32 = arith.constant 0 : i32
    %c0_i32_0 = arith.constant 0 : i32
    %c0_i32_1 = arith.constant 0 : i32
    return %c0_i32, %c0_i32_0 : i32, i32
  }
  func.func @transform_5(%arg0: i32) -> (i32, i32) {
    %c0_i32 = arith.constant 0 : i32
    %c0_i32_0 = arith.constant 0 : i32
    return %arg0, %c0_i32 : i32, i32
  }
}

</mosaic_0001>

<bundles_post_ra>
// kernel: head_forward.1
= control target key start
LH: loop header
LB: loop body
LE: loop exit
PB: predicated region body
PF: predicated region fallthrough
CT: control target
= control target key end

     0   :  { %v337_v0 = vmov 0.0   ;;  %vm338_vm0 = vmmov 0   ;;  %vm51_vm1 = vcmask 261120   ;;  %v196_v48 = vlaneseq  ;;  %s438_s1 = inlined_call_operand.vmem [shape: bf16[32,128], index: 1, kind: input, shape index: {}]   ;;  %s439_s3 = inlined_call_operand.vmem [shape: f32[128,8], index: 3, kind: input, shape index: {}]   ;;  %s440_s0 = inlined_call_operand.vmem [shape: bf16[16,32], index: 0, kind: input, shape index: {}]   ;;  %s441_s2 = inlined_call_operand.vmem [shape: f32[1,128], index: 2, kind: input, shape index: {}]   ;;  %s442_s4 = inlined_call_operand.vmem [shape: f32[1,8], index: 4, kind: input, shape index: {}]   ;;  %s443_s5 = inlined_call_operand.vmem [shape: f32[16,8], index: 5, kind: output, shape index: {}]  }
   0x1   :  { %249 = vmatprep.subr.bf16.mxu0 %v337_v0  ;;  %v326_v1 = vld [vmem:[%s438_s1] sm:$0xff]   ;;  %253 = vmatprep.mubr.msk.bf16.mxu0 %vm338_vm0, %v337_v0  ;;  %v327_v2 = vld [vmem:[%s438_s1 + $0x8] sm:$0xff]   ;;  %v100_v5 = vld [vmem:[%s439_s3 + $0x10] sm:$0xff]  ;;  %vm213_vm3 = vcmask 64512  }
   0x2   :  { %250 = vmatpush3.bf16.msra.mxu0 %v326_v1  ;;  %v98_v3 = vld [vmem:[%s439_s3] sm:$0xff]  ;;  %v99_v4 = vld [vmem:[%s439_s3 + $0x8] sm:$0xff]  ;;  %v101_v7 = vld [vmem:[%s439_s3 + $0x18] sm:$0xff]  ;;  %v197_v49 = vand.u32 127, %v196_v48 }
   0x3   :  { %251 = vmatprep.subr.bf16.mxu0 %v337_v0  ;;  %v292_v6 = vpack.c.bf16 %v99_v4, %v98_v3  ;;  %v328_v8 = vld [vmem:[%s440_s0] sm:$0xff]   ;;  %v296_v9 = vpack.c.bf16 %v101_v7, %v100_v5  ;;  %v103_v11 = vld [vmem:[%s439_s3 + $0x28] sm:$0xff]  ;;  %v104_v13 = vld [vmem:[%s439_s3 + $0x30] sm:$0xff] }
   0x4   :  { %v102_v10 = vld [vmem:[%s439_s3 + $0x20] sm:$0xff]  ;;  %v105_v14 = vld [vmem:[%s439_s3 + $0x38] sm:$0xff]  ;;  %v107_v17 = vld [vmem:[%s439_s3 + $0x48] sm:$0xff]  ;;  %vm198_vm2 = vcmp.eq.s32.totalorder %v197_v49, 0 }
   0x5   :  { %293 = vmatprep.subr.bf16.mxu1 %v292_v6  ;;  %v300_v12 = vpack.c.bf16 %v103_v11, %v102_v10  ;;  %v304_v15 = vpack.c.bf16 %v105_v14, %v104_v13  ;;  %v106_v16 = vld [vmem:[%s439_s3 + $0x40] sm:$0xff]  ;;  %v108_v19 = vld [vmem:[%s439_s3 + $0x50] sm:$0xff]  ;;  %v109_v20 = vld [vmem:[%s439_s3 + $0x58] sm:$0xff] }
   0x6   :  { %252 = vmatpush3.bf16.msra.mxu0 %v327_v2  ;;  %295 = vmatpush3.bf16.msra.mxu1 %v292_v6  ;;  %v308_v18 = vpack.c.bf16 %v107_v17, %v106_v16  ;;  %v312_v21 = vpack.c.bf16 %v109_v20, %v108_v19  ;;  %v110_v22 = vld [vmem:[%s439_s3 + $0x60] sm:$0xff]  ;;  %v111_v23 = vld [vmem:[%s439_s3 + $0x68] sm:$0xff]  ;;  %v112_v25 = vld [vmem:[%s439_s3 + $0x70] sm:$0xff] }
   0x7   :  { %297 = vmatprep.subr.bf16.mxu1 %v296_v9  ;;  %v316_v24 = vpack.c.bf16 %v111_v23, %v110_v22  ;;  %v113_v26 = vld [vmem:[%s439_s3 + $0x78] sm:$0xff]  ;;  %v220_v28 = vld [vmem:[%s441_s2] ss:$0 sm:$0xff] }
   0x8   :  { %v320_v27 = vpack.c.bf16 %v113_v26, %v112_v25  ;;  %v225_v37 = vld [vmem:[%s442_s4] ss:$0 sm:$0xff] }
   0x9   :  { %254 = vmatmul.mubr.msk.bf16.vlgmr.msra.gmra.mrb[0].mxu0 %vm51_vm1, %v328_v8 }
   0xa   :  { %299 = vmatpush3.bf16.msra.mxu1 %v296_v9 }
   0xb   :  { %301 = vmatprep.subr.bf16.mxu1 %v300_v12 }
   0xe   :  { %303 = vmatpush3.bf16.msra.mxu1 %v300_v12 }
   0xf   :  { %305 = vmatprep.subr.bf16.mxu1 %v304_v15 }
  0x12   :  { %307 = vmatpush3.bf16.msra.mxu1 %v304_v15 }
  0x13   :  { %309 = vmatprep.subr.bf16.mxu1 %v308_v18 }
  0x16   :  { %311 = vmatpush3.bf16.msra.mxu1 %v308_v18 }
  0x17   :  { %313 = vmatprep.subr.bf16.mxu1 %v312_v21 }
  0x1a   :  { %315 = vmatpush3.bf16.msra.mxu1 %v312_v21 }
  0x1b   :  { %317 = vmatprep.subr.bf16.mxu1 %v316_v24 }
  0x1e   :  { %319 = vmatpush3.bf16.msra.mxu1 %v316_v24 }
  0x1f   :  { %321 = vmatprep.subr.bf16.mxu1 %v320_v27 }
  0x22   :  { %323 = vmatpush3.bf16.msra.mxu1 %v320_v27 }
  0xdc   :  { %v89_v29 = vpop.f32.mrb[0].mxu0 }
  0xdd   :  { %v255_v30 = vpop.f32.mrb[1].mxu0  ;;  %v90_v31 = vadd.f32 %v220_v28, %v89_v29 }
  0xde   :  { %v92_v32 = vpop.f32.mrb[2].mxu0 }
  0xdf   :  { %v93_v33 = vadd.f32 %v220_v28, %v92_v32  ;;  %v256_v34 = vpop.f32.mrb[3].mxu0  ;;  %v96_v35 = vmax.f32 %v90_v31, 0.0 }
  0xe1   :  { %v97_v36 = vmax.f32 %v93_v33, 0.0  ;;  %289 = vmatprep.mubr.f32.mxu1 %v96_v35 }
  0xe3   :  { %290 = vmatmul.mubr.f32.vlgmr.msra.gmra.mrb[0].mxu1 %v97_v36 }
 0x1b6   :  { %v291_v38 = vpop.f32.mrb[0].mxu1 }
 0x1b7   :  { %v193_v39 = vadd.f32 %v291_v38, %v225_v37  ;;  %v187_v40 = vpop.f32.mrb[1].mxu1 }
 0x1b8   :  { %v188_v41 = vadd.f32 %v225_v37, %v187_v40 }
 0x1b9   :  { %v227_v42 = vmul.f32 -1.442695, %v193_v39 }
 0x1ba   :  { %v226_v43 = vmul.f32 -1.442695, %v188_v41 }
 0x1bb   :  { %329 = vpow2.f32 %v227_v42 }
 0x1bc   :  { %331 = vpow2.f32 %v226_v43 }
 0x1c5   :  { %v330_v44 = vpop.eup %329 }
 0x1c6   :  { %v332_v45 = vpop.eup %331  ;;  %v206_v46 = vadd.f32 1.0, %v330_v44 }
 0x1c7   :  { %v205_v47 = vadd.f32 1.0, %v332_v45 }
 0x1c8   :  { %333 = vrcp.f32 %v206_v46 }
 0x1c9   :  { %335 = vrcp.f32 %v205_v47 }
 0x1d2   :  { %v334_v50 = vpop.eup %333 }
 0x1d3   :  { %v336_v51 = vpop.eup %335  ;;  %v212_v52 = vsel %vm198_vm2, %v334_v50, %v193_v39 }
 0x1d4   :  { %215 = vst.msk [vmem:[%s443_s5 + $0x8] sm:$0xff] %vm213_vm3, %v212_v52  ;;  %v211_v53 = vsel %vm198_vm2, %v336_v51, %v188_v41 }
 0x1d5   :  { %214 = vst.msk [vmem:[%s443_s5] sm:$0xff] %vm213_vm3, %v211_v53 }

</bundles_post_ra>
